<compile_context>
chip_gen: v5e
topology: v5e:2x2
jax: 0.10.0
libtpu: 0.0.40
codegen_flags: <defaults>
</compile_context>

<pallas_src>
import jax
import jax.numpy as jnp
from jax.experimental import pallas as pl
from jax.experimental.pallas import tpu as pltpu

_LANE = 128
_ROW_Q = 16                      # row-tile quantum (bf16 sublane packing)
_MIB = 1024 * 1024
_GELU_C = 0.7978845608028654     # sqrt(2/pi)


def _round_up(x, m):
    return (x + m - 1) // m * m


def _cdiv(a, b):
    return -(-a // b)


def _pick_tile(padded_dim, desired, quantum=_LANE):
    """Largest multiple of `quantum` that divides `padded_dim` and is <= desired."""
    t = min(desired, padded_dim)
    t = max((t // quantum) * quantum, quantum)
    while padded_dim % t:
        t -= quantum
    return t


def _vmem_budget():
    """(vmem_limit_bytes for CompilerParams, byte budget for tile selection)."""
    try:
        cap = int(pltpu.get_tpu_info().vmem_capacity_bytes)
    except Exception:
        cap = 0
    if cap < 32 * _MIB:           # query failed / implausible -> conservative
        cap = 64 * _MIB           # safe on v5e / v6e / v7x
    vmem_limit = int(cap * 0.85)
    budget = max(vmem_limit - 8 * _MIB, 16 * _MIB)
    return vmem_limit, budget


def _select_tiles(M, dm_p, dh_p, x_bytes, out_bytes, budget):
    """Return (tile_m, tile_h).  tile_h == dh_p means full-weight residency."""
    # Row-tile cap: hug small batches; keep >=2 row tiles for megacore when that
    # does not push tile_m below 512 (weight-stream intensity floor).
    cap = min(1024, _round_up(M, _ROW_Q))
    half = _round_up(_cdiv(M, 2), _ROW_Q)
    if half >= 512:
        cap = min(cap, half)
    cap = max(cap, _ROW_Q)

    # ---- fast path: both bf16 weight matrices resident in VMEM (1-D grid) ----
    w_resident = 2 * (2 * dm_p * dh_p * 2)                 # w1+w2, dbl-buffered worst case
    per_row_fast = (2 * dm_p * x_bytes                     # x (double buffered)
                    + 2 * dm_p * out_bytes                 # out (double buffered)
                    + dh_p * 6                             # h (f32) + g (bf16) temporaries
                    + dm_p * 4)                            # f32 matmul result
    if w_resident + _ROW_Q * per_row_fast <= budget:
        tile_m = (budget - w_resident) // per_row_fast
        tile_m = max(_ROW_Q, min(cap, tile_m // _ROW_Q * _ROW_Q))
        return tile_m, dh_p

    # ---- streaming path: tile the hidden axis, accumulate across it ----------
    best_m, best_h = _ROW_Q, _pick_tile(dh_p, _LANE)
    for want_h in (512, 384, 256, 128):
        tile_h = _pick_tile(dh_p, want_h)
        per_step_w = 2 * (2 * dm_p * tile_h * 2)           # w1+w2 slices, dbl-buffered
        per_row = (2 * dm_p * x_bytes + 2 * dm_p * out_bytes
                   + dm_p * 4                              # f32 accumulator (scratch or out)
                   + tile_h * 6)                           # h/g temporaries
        if budget <= per_step_w + _ROW_Q * per_row:
            continue
        tm = (budget - per_step_w) // per_row
        tm = max(_ROW_Q, min(cap, tm // _ROW_Q * _ROW_Q))
        if (tm, tile_h) > (best_m, best_h):                # tile_m first, tile_h tie-break
            best_m, best_h = tm, tile_h
    return best_m, best_h


def _gelu(h):
    # NewGELU in f32: 0.5*x*(1 + tanh(sqrt(2/pi)*(x + 0.044715*x^3)))
    return 0.5 * h * (1.0 + jnp.tanh(_GELU_C * (h + 0.044715 * (h * h * h))))


# ----------------------------- kernels ---------------------------------------

def _ffn_fused_kernel(x_ref, w1_ref, b1_ref, w2_ref, b2_ref, o_ref):
    """Full hidden dim in one step (weights resident in VMEM)."""
    h = jnp.dot(x_ref[...], w1_ref[...], preferred_element_type=jnp.float32)
    g = _gelu(h + b1_ref[...])
    y = jnp.dot(g.astype(w2_ref.dtype), w2_ref[...],
                preferred_element_type=jnp.float32)
    o_ref[...] = (y + b2_ref[...]).astype(o_ref.dtype)


def _ffn_stream_f32out_kernel(x_ref, w1_ref, b1_ref, w2_ref, b2_ref, o_ref):
    """Hidden axis tiled; accumulate directly into the resident f32 output."""
    j = pl.program_id(1)

    @pl.when(j == 0)
    def _init():
        o_ref[...] = jnp.zeros_like(o_ref)

    h = jnp.dot(x_ref[...], w1_ref[...], preferred_element_type=jnp.float32)
    g = _gelu(h + b1_ref[...])
    o_ref[...] += jnp.dot(g.astype(w2_ref.dtype), w2_ref[...],
                          preferred_element_type=jnp.float32)

    @pl.when(j == pl.num_programs(1) - 1)
    def _finalize():
        o_ref[...] += b2_ref[...]


def _ffn_stream_acc_kernel(x_ref, w1_ref, b1_ref, w2_ref, b2_ref, o_ref, acc_ref):
    """Hidden axis tiled; f32 scratch accumulator for non-f32 output dtypes."""
    j = pl.program_id(1)

    @pl.when(j == 0)
    def _init():
        acc_ref[...] = jnp.zeros_like(acc_ref)

    h = jnp.dot(x_ref[...], w1_ref[...], preferred_element_type=jnp.float32)
    g = _gelu(h + b1_ref[...])
    acc_ref[...] += jnp.dot(g.astype(w2_ref.dtype), w2_ref[...],
                            preferred_element_type=jnp.float32)

    @pl.when(j == pl.num_programs(1) - 1)
    def _finalize():
        o_ref[...] = (acc_ref[...] + b2_ref[...]).astype(o_ref.dtype)


# ----------------------------- host-side wrappers -----------------------------

def prepare_params(w1, b1, w2, b2, *, compute_dtype=jnp.bfloat16):
    """One-time conversion of PyTorch-layout params to kernel layout.

    w1: (4d, d), b1: (4d,), w2: (d, 4d), b2: (d,) -> transposed, cast to the MXU
    compute dtype, zero-padded so feature dims are multiples of 128.  Call once
    at parameter-load time, not per forward call.
    """
    d_hidden, d_model = w1.shape
    dm_p = _round_up(d_model, _LANE)
    dh_p = _round_up(d_hidden, _LANE)

    w1_t = jnp.zeros((dm_p, dh_p), compute_dtype)
    w1_t = w1_t.at[:d_model, :d_hidden].set(w1.T.astype(compute_dtype))
    w2_t = jnp.zeros((dh_p, dm_p), compute_dtype)
    w2_t = w2_t.at[:d_hidden, :d_model].set(w2.T.astype(compute_dtype))
    b1_p = jnp.zeros((1, dh_p), jnp.float32).at[:, :d_hidden].set(
        b1.astype(jnp.float32)[None, :])
    b2_p = jnp.zeros((1, dm_p), jnp.float32).at[:, :d_model].set(
        b2.astype(jnp.float32)[None, :])

    return {"w1_t": w1_t, "b1": b1_p, "w2_t": w2_t, "b2": b2_p}


def feedforward(e, params, *, tile_m=None, tile_h=None, out_dtype=None):
    """e: (batch, seq, d_model); params from prepare_params()."""
    batch, seq, d_model = e.shape
    w1_t, b1 = params["w1_t"], params["b1"]
    w2_t, b2 = params["w2_t"], params["b2"]
    dm_p, dh_p = w1_t.shape
    compute_dtype = w1_t.dtype
    out_dtype = e.dtype if out_dtype is None else jnp.dtype(out_dtype)
    x_bytes = jnp.dtype(compute_dtype).itemsize
    out_bytes = jnp.dtype(out_dtype).itemsize

    M = batch * seq
    vmem_limit, budget = _vmem_budget()

    sel_m, sel_h = _select_tiles(M, dm_p, dh_p, x_bytes, out_bytes, budget)
    if tile_m is not None:
        sel_m = max(_ROW_Q, _round_up(int(tile_m), _ROW_Q))
    if tile_h is not None:
        sel_h = _pick_tile(dh_p, max(_LANE, int(tile_h)))

    # Minimize row padding: keep the same number of row tiles, but have the tile
    # hug ceil(M / n_tiles) instead of the raw budget-derived size.
    n_rows = _cdiv(M, sel_m)
    sel_m = _round_up(_cdiv(M, n_rows), _ROW_Q)
    M_p = n_rows * sel_m

    # Activations: only materialize a padded copy when actually ragged.
    x2 = e.reshape(M, d_model)
    if (M_p != M) or (dm_p != d_model):
        x = jnp.zeros((M_p, dm_p), compute_dtype).at[:M, :d_model].set(
            x2.astype(compute_dtype))
    else:
        x = x2.astype(compute_dtype)

    out_shape = jax.ShapeDtypeStruct((M_p, dm_p), out_dtype)

    if sel_h == dh_p:
        # Weight-resident fast path: 1-D grid over row tiles, weights DMA'd once
        # and kept resident (constant index maps).
        out = pl.pallas_call(
            _ffn_fused_kernel,
            out_shape=out_shape,
            grid_spec=pltpu.PrefetchScalarGridSpec(
                num_scalar_prefetch=0,
                grid=(M_p // sel_m,),
                in_specs=[
                    pl.BlockSpec((sel_m, dm_p), lambda i: (i, 0)),   # x rows
                    pl.BlockSpec((dm_p, dh_p), lambda i: (0, 0)),    # W1 (resident)
                    pl.BlockSpec((1, dh_p), lambda i: (0, 0)),       # b1
                    pl.BlockSpec((dh_p, dm_p), lambda i: (0, 0)),    # W2 (resident)
                    pl.BlockSpec((1, dm_p), lambda i: (0, 0)),       # b2
                ],
                out_specs=pl.BlockSpec((sel_m, dm_p), lambda i: (i, 0)),
            ),
            compiler_params=pltpu.CompilerParams(
                dimension_semantics=("parallel",),
                vmem_limit_bytes=vmem_limit),
        )(x, w1_t, b1, w2_t, b2)
    else:
        # Streaming path: hidden axis is the reduction of the down-projection.
        grid = (M_p // sel_m, dh_p // sel_h)
        in_specs = [
            pl.BlockSpec((sel_m, dm_p), lambda i, j: (i, 0)),        # x rows
            pl.BlockSpec((dm_p, sel_h), lambda i, j: (0, j)),        # W1 slice
            pl.BlockSpec((1, sel_h), lambda i, j: (0, j)),           # b1 slice
            pl.BlockSpec((sel_h, dm_p), lambda i, j: (j, 0)),        # W2 slice
            pl.BlockSpec((1, dm_p), lambda i, j: (0, 0)),            # b2
        ]
        out_spec = pl.BlockSpec((sel_m, dm_p), lambda i, j: (i, 0))
        cparams = pltpu.CompilerParams(
            dimension_semantics=("parallel", "arbitrary"),
            vmem_limit_bytes=vmem_limit)

        if out_dtype == jnp.dtype(jnp.float32):
            # Accumulate directly into the resident f32 output block (no scratch).
            out = pl.pallas_call(
                _ffn_stream_f32out_kernel,
                out_shape=out_shape,
                grid_spec=pltpu.PrefetchScalarGridSpec(
                    num_scalar_prefetch=0, grid=grid,
                    in_specs=in_specs, out_specs=out_spec),
                compiler_params=cparams,
            )(x, w1_t, b1, w2_t, b2)
        else:
            out = pl.pallas_call(
                _ffn_stream_acc_kernel,
                out_shape=out_shape,
                grid_spec=pltpu.PrefetchScalarGridSpec(
                    num_scalar_prefetch=0, grid=grid,
                    in_specs=in_specs, out_specs=out_spec,
                    scratch_shapes=[pltpu.VMEM((sel_m, dm_p), jnp.float32)]),
                compiler_params=cparams,
            )(x, w1_t, b1, w2_t, b2)

    if (M_p != M) or (dm_p != d_model):
        out = out[:M, :d_model]
    return out.reshape(batch, seq, d_model)


def _reference(e, w1, b1, w2, b2):
    h = jnp.einsum("bsd,hd->bsh", e, w1) + b1
    g = 0.5 * h * (1.0 + jnp.tanh(_GELU_C * (h + 0.044715 * h ** 3)))
    return jnp.einsum("bsh,dh->bsd", g, w2) + b2


if __name__ == "__main__":
    key = jax.random.PRNGKey(0)
    batch, seq, d_model = 2, 8, 32
    d_hidden = 4 * d_model

    k_e, k_w1, k_b1, k_w2, k_b2 = jax.random.split(key, 5)
    e = jax.random.normal(k_e, (batch, seq, d_model), dtype=jnp.float32)

    # PyTorch-style parameter shapes: weights are (out_features, in_features).
    w1 = jax.random.normal(k_w1, (d_hidden, d_model), dtype=jnp.float32) * 0.02
    b1 = jax.random.normal(k_b1, (d_hidden,), dtype=jnp.float32) * 0.02
    w2 = jax.random.normal(k_w2, (d_model, d_hidden), dtype=jnp.float32) * 0.02
    b2 = jax.random.normal(k_b2, (d_model,), dtype=jnp.float32) * 0.02

    params = prepare_params(w1, b1, w2, b2)      # one-time layout / bf16 prep
    ffn = jax.jit(feedforward)
    out = ffn(e, params)                         # weight-resident fast path
    jax.block_until_ready(out)

    ref = _reference(e, w1, b1, w2, b2)
    assert out.shape == (batch, seq, d_model)
    # bf16 MXU compute with f32 accumulation: allow bf16-level tolerance.
    assert jnp.allclose(out.astype(jnp.float32), ref, atol=1e-2, rtol=1e-2), \
        "fast-path mismatch vs reference"

    # Also exercise the streaming (hidden-tiled) kernels on a slightly larger
    # d_model by forcing tile_h < 4*d_model (this is the large-model code path).
    d_model2 = 64
    d_hidden2 = 4 * d_model2
    k2 = jax.random.split(key, 6)
    e2 = jax.random.normal(k2[0], (batch, seq, d_model2), dtype=jnp.float32)
    w1b = jax.random.normal(k2[1], (d_hidden2, d_model2), dtype=jnp.float32) * 0.02
    b1b = jax.random.normal(k2[2], (d_hidden2,), dtype=jnp.float32) * 0.02
    w2b = jax.random.normal(k2[3], (d_model2, d_hidden2), dtype=jnp.float32) * 0.02
    b2b = jax.random.normal(k2[4], (d_model2,), dtype=jnp.float32) * 0.02
    params2 = prepare_params(w1b, b1b, w2b, b2b)
    ref2 = _reference(e2, w1b, b1b, w2b, b2b)

    out2 = feedforward(e2, params2, tile_h=128)                  # f32-output accumulator
    jax.block_until_ready(out2)
    assert jnp.allclose(out2.astype(jnp.float32), ref2, atol=1e-2, rtol=1e-2), \
        "streaming f32-out mismatch vs reference"

    out3 = feedforward(e2, params2, tile_h=128, out_dtype=jnp.bfloat16)  # scratch accumulator
    jax.block_until_ready(out3)
    assert jnp.allclose(out3.astype(jnp.float32), ref2, atol=2e-2, rtol=2e-2), \
        "streaming bf16-out mismatch vs reference"

    print("KERNEL_OK")
</pallas_src>

<mosaic_0001>
module attributes {stable_mosaic.version = 11 : i64} {
  func.func @_ffn_fused_kernel(%arg0: i32, %arg1: memref<16x128xbf16, #tpu.memory_space<vmem>>, %arg2: memref<128x128xbf16, #tpu.memory_space<vmem>>, %arg3: memref<1x128xf32, #tpu.memory_space<vmem>>, %arg4: memref<128x128xbf16, #tpu.memory_space<vmem>>, %arg5: memref<1x128xf32, #tpu.memory_space<vmem>>, %arg6: memref<16x128xf32, #tpu.memory_space<vmem>>) attributes {dimension_semantics = [#tpu.dimension_semantics<parallel>], iteration_bounds = array<i64: 1>, scalar_prefetch = 0 : i64, scratch_operands = 0 : i64, tpu.core_type = #tpu.core_type<tc>, window_params = [{transform_indices = @transform_0, window_bounds = array<i64: 16, 128>}, {pipeline_mode = #tpu.pipeline_mode<synchronous>, transform_indices = @transform_1, window_bounds = array<i64: 128, 128>}, {pipeline_mode = #tpu.pipeline_mode<synchronous>, transform_indices = @transform_2, window_bounds = array<i64: 1, 128>}, {pipeline_mode = #tpu.pipeline_mode<synchronous>, transform_indices = @transform_3, window_bounds = array<i64: 128, 128>}, {pipeline_mode = #tpu.pipeline_mode<synchronous>, transform_indices = @transform_4, window_bounds = array<i64: 1, 128>}, {transform_indices = @transform_5, window_bounds = array<i64: 16, 128>}]} {
    %c0 = arith.constant 0 : index
    %c0_0 = arith.constant 0 : index
    %0 = vector.load %arg1[%c0, %c0_0] : memref<16x128xbf16, #tpu.memory_space<vmem>>, vector<16x128xbf16>
    %c0_1 = arith.constant 0 : index
    %c0_2 = arith.constant 0 : index
    %1 = vector.load %arg2[%c0_1, %c0_2] : memref<128x128xbf16, #tpu.memory_space<vmem>>, vector<128x128xbf16>
    %cst = arith.constant dense<0.000000e+00> : vector<16x128xf32>
    %2 = tpu.matmul %0, %1, %cst {dimension_numbers = #tpu.dot_dimension_numbers<[1], [0], [0], [1], [0, 0, 1, 1], [], []>} : vector<16x128xbf16>, vector<128x128xbf16>, vector<16x128xf32> -> vector<16x128xf32>
    %c0_3 = arith.constant 0 : index
    %c0_4 = arith.constant 0 : index
    %3 = vector.load %arg3[%c0_3, %c0_4] : memref<1x128xf32, #tpu.memory_space<vmem>>, vector<1x128xf32>
    %4 = vector.broadcast %3 : vector<1x128xf32> to vector<16x128xf32>
    %5 = arith.addf %2, %4 : vector<16x128xf32>
    %cst_5 = arith.constant 5.000000e-01 : f32
    %6 = vector.broadcast %cst_5 : f32 to vector<16x128xf32>
    %7 = arith.mulf %6, %5 : vector<16x128xf32>
    %8 = arith.mulf %5, %5 : vector<16x128xf32>
    %9 = arith.mulf %8, %5 : vector<16x128xf32>
    %cst_6 = arith.constant 4.471500e-02 : f32
    %10 = vector.broadcast %cst_6 : f32 to vector<16x128xf32>
    %11 = arith.mulf %10, %9 : vector<16x128xf32>
    %12 = arith.addf %5, %11 : vector<16x128xf32>
    %cst_7 = arith.constant 0.797884583 : f32
    %13 = vector.broadcast %cst_7 : f32 to vector<16x128xf32>
    %14 = arith.mulf %13, %12 : vector<16x128xf32>
    %15 = math.tanh %14 : vector<16x128xf32>
    %cst_8 = arith.constant 1.000000e+00 : f32
    %16 = vector.broadcast %cst_8 : f32 to vector<16x128xf32>
    %17 = arith.addf %16, %15 : vector<16x128xf32>
    %18 = arith.mulf %7, %17 : vector<16x128xf32>
    %19 = arith.truncf %18 : vector<16x128xf32> to vector<16x128xbf16>
    %c0_9 = arith.constant 0 : index
    %c0_10 = arith.constant 0 : index
    %20 = vector.load %arg4[%c0_9, %c0_10] : memref<128x128xbf16, #tpu.memory_space<vmem>>, vector<128x128xbf16>
    %cst_11 = arith.constant dense<0.000000e+00> : vector<16x128xf32>
    %21 = tpu.matmul %19, %20, %cst_11 {dimension_numbers = #tpu.dot_dimension_numbers<[1], [0], [0], [1], [0, 0, 1, 1], [], []>} : vector<16x128xbf16>, vector<128x128xbf16>, vector<16x128xf32> -> vector<16x128xf32>
    %c0_12 = arith.constant 0 : index
    %c0_13 = arith.constant 0 : index
    %22 = vector.load %arg5[%c0_12, %c0_13] : memref<1x128xf32, #tpu.memory_space<vmem>>, vector<1x128xf32>
    %23 = vector.broadcast %22 : vector<1x128xf32> to vector<16x128xf32>
    %24 = arith.addf %21, %23 : vector<16x128xf32>
    %c0_14 = arith.constant 0 : index
    %c0_15 = arith.constant 0 : index
    %25 = vector.load %arg6[%c0_14, %c0_15] : memref<16x128xf32, #tpu.memory_space<vmem>>, vector<16x128xf32>
    tpu.vector_store %arg6[%c0_14, %c0_15], %24 {strides = array<i32>} : memref<16x128xf32, #tpu.memory_space<vmem>>, vector<16x128xf32>,
    return
  }
  func.func @transform_0(%arg0: i32) -> (i32, i32) {
    %c0_i32 = arith.constant 0 : i32
    %c0_i32_0 = arith.constant 0 : i32
    return %arg0, %c0_i32 : i32, i32
  }
  func.func @transform_1(%arg0: i32) -> (i32, i32) {
    %c0_i32 = arith.constant 0 : i32
    %c0_i32_0 = arith.constant 0 : i32
    %c0_i32_1 = arith.constant 0 : i32
    return %c0_i32, %c0_i32_0 : i32, i32
  }
  func.func @transform_2(%arg0: i32) -> (i32, i32) {
    %c0_i32 = arith.constant 0 : i32
    %c0_i32_0 = arith.constant 0 : i32
    %c0_i32_1 = arith.constant 0 : i32
    return %c0_i32, %c0_i32_0 : i32, i32
  }
  func.func @transform_3(%arg0: i32) -> (i32, i32) {
    %c0_i32 = arith.constant 0 : i32
    %c0_i32_0 = arith.constant 0 : i32
    %c0_i32_1 = arith.constant 0 : i32
    return %c0_i32, %c0_i32_0 : i32, i32
  }
  func.func @transform_4(%arg0: i32) -> (i32, i32) {
    %c0_i32 = arith.constant 0 : i32
    %c0_i32_0 = arith.constant 0 : i32
    %c0_i32_1 = arith.constant 0 : i32
    return %c0_i32, %c0_i32_0 : i32, i32
  }
  func.func @transform_5(%arg0: i32) -> (i32, i32) {
    %c0_i32 = arith.constant 0 : i32
    %c0_i32_0 = arith.constant 0 : i32
    return %arg0, %c0_i32 : i32, i32
  }
}

</mosaic_0001>

<bundles_post_ra>
// kernel: feedforward.1
= control target key start
LH: loop header
LB: loop body
LE: loop exit
PB: predicated region body
PF: predicated region fallthrough
CT: control target
= control target key end

     0   :  { %10 = vsyncpa [#allocation3], 0  ;;  %s453_s0 = inlined_call_operand.vmem [shape: bf16[16,128], index: 0, kind: input, shape index: {}]   ;;  %s454_s1 = inlined_call_operand.hbm [shape: bf16[128,128], index: 1, kind: input, shape index: {}]   ;;  %s455_s2 = inlined_call_operand.vmem [shape: f32[1,128], index: 2, kind: input, shape index: {}]   ;;  %s456_s3 = inlined_call_operand.hbm [shape: bf16[128,128], index: 3, kind: input, shape index: {}]   ;;  %s457_s4 = inlined_call_operand.vmem [shape: f32[1,128], index: 4, kind: input, shape index: {}]   ;;  %s458_s5 = inlined_call_operand.vmem [shape: f32[16,128], index: 5, kind: output, shape index: {}]  }
   0x1   :  { %s18_s20 = sshll.u32 %s454_s1, 4  ;;  %s19_s20 = int_to_ptr.hbm [resolvable:$true] %s18_s20 }
   0x2   :  { %11 = vsyncpa [#allocation5], 0  ;;  %s398_s21 = smov [#allocation2]   ;;  %s33_s25 = sshll.u32 %s456_s3, 4  ;;  %s34_s25 = int_to_ptr.hbm [resolvable:$true] %s33_s25 }
   0x3   :  { %s20_s22 = sshll.u32 %s398_s21, 4  ;;  %s399_s26 = smov 64   ;;  %s21_s22 = int_to_ptr.vmem [resolvable:$true] %s20_s22 }
   0x4   :  { %s400_s27 = smov 4   ;;  %s401_s28 = smov [#allocation4]  }
   0x5   :  { %26 = dma.hbm_to_vmem [thread:$0]  %s19_s20, 1024, %s21_s22, [#allocation3], %s399_s26, %s399_s26, %s400_s27  }
   0x6   :  { %s35_s29 = sshll.u32 %s401_s28, 4  ;;  %s36_s29 = int_to_ptr.vmem [resolvable:$true] %s35_s29 }
   0x7   :  { %41 = dma.hbm_to_vmem [thread:$0]  %s34_s25, 1024, %s36_s29, [#allocation5], %s399_s26, %s399_s26, %s400_s27  }
   0x8   :  { %394 = dma.done.wait [#allocation3], 1024  }
   0x9   :  { %395 = vsyncadd [#allocation3], 4294966272 }
   0xa   :  { %396 = dma.done.wait [#allocation5], 1024  }
   0xb   :  { %397 = vsyncadd [#allocation5], 4294966272  ;;  %v327_v0 = vld [vmem:[#allocation2 + $0x38] sm:$0xff]  ;;  %v326_v1 = vld [vmem:[#allocation2 + $0x30] sm:$0xff] }
   0xc   :  { %128 = vmatpush.bf16.msra.mxu0 %v327_v0  ;;  %v325_v2 = vld [vmem:[#allocation2 + $0x28] sm:$0xff]  ;;  %v324_v3 = vld [vmem:[#allocation2 + $0x20] sm:$0xff]  ;;  %v323_v4 = vld [vmem:[#allocation2 + $0x18] sm:$0xff] }
   0xd   :  { %v322_v5 = vld [vmem:[#allocation2 + $0x10] sm:$0xff]  ;;  %v321_v6 = vld [vmem:[#allocation2 + $0x8] sm:$0xff]  ;;  %v320_v7 = vld [vmem:[#allocation2] sm:$0xff] }
   0xe   :  { %v319_v8 = vld [vmem:[%s453_s0] sm:$0xff]  ;;  %v335_v9 = vld [vmem:[#allocation4 + $0x38] sm:$0xff]  ;;  %v334_v10 = vld [vmem:[#allocation4 + $0x30] sm:$0xff] }
   0xf   :  { %229 = vmatpush.bf16.msra.mxu1 %v335_v9  ;;  %v333_v11 = vld [vmem:[#allocation4 + $0x28] sm:$0xff]  ;;  %v332_v12 = vld [vmem:[#allocation4 + $0x20] sm:$0xff]  ;;  %v331_v13 = vld [vmem:[#allocation4 + $0x18] sm:$0xff] }
  0x10   :  { %129 = vmatpush.bf16.msra.mxu0 %v326_v1  ;;  %v330_v14 = vld [vmem:[#allocation4 + $0x10] sm:$0xff]  ;;  %v329_v15 = vld [vmem:[#allocation4 + $0x8] sm:$0xff]  ;;  %v328_v16 = vld [vmem:[#allocation4] sm:$0xff] }
  0x11   :  { %v340_v17 = vld [vmem:[%s455_s2] ss:$0 sm:$0xff] }
  0x12   :  { %v341_v41 = vld [vmem:[%s457_s4] ss:$0 sm:$0xff] }
  0x13   :  { %230 = vmatpush.bf16.msra.mxu1 %v334_v10 }
  0x14   :  { %130 = vmatpush.bf16.msra.mxu0 %v325_v2 }
  0x17   :  { %231 = vmatpush.bf16.msra.mxu1 %v333_v11 }
  0x18   :  { %131 = vmatpush.bf16.msra.mxu0 %v324_v3 }
  0x1b   :  { %232 = vmatpush.bf16.msra.mxu1 %v332_v12 }
  0x1c   :  { %132 = vmatpush.bf16.msra.mxu0 %v323_v4 }
  0x1f   :  { %233 = vmatpush.bf16.msra.mxu1 %v331_v13 }
  0x20   :  { %133 = vmatpush.bf16.msra.mxu0 %v322_v5 }
  0x23   :  { %234 = vmatpush.bf16.msra.mxu1 %v330_v14 }
  0x24   :  { %134 = vmatpush.bf16.msra.mxu0 %v321_v6 }
  0x27   :  { %235 = vmatpush.bf16.msra.mxu1 %v329_v15 }
  0x28   :  { %135 = vmatpush.bf16.msra.mxu0 %v320_v7 }
  0x2b   :  { %136 = vmatmul.bf16.vlgmr.msra.gmra.mxu0 %v319_v8  ;;  %236 = vmatpush.bf16.msra.mxu1 %v328_v16 }
  0xa8   :  { %v137_v18 = vpop.f32.mrf.mxu0 }
  0xa9   :  { %v138_v19 = vadd.f32 %v340_v17, %v137_v18 }
  0xab   :  { %v144_v20 = vmul.f32 %v138_v19, %v138_v19  ;;  %v142_v35 = vmul.f32 0.5, %v138_v19 }
  0xad   :  { %v146_v21 = vmul.f32 %v144_v20, %v138_v19 }
  0xaf   :  { %v148_v22 = vmul.f32 0.044715, %v146_v21 }
  0xb0   :  { %v139_v23 = vpop.f32.mrf.mxu0 }
  0xb1   :  { %v140_v24 = vadd.f32 %v340_v17, %v139_v23  ;;  %v150_v25 = vadd.f32 %v148_v22, %v138_v19 }
  0xb3   :  { %v145_v26 = vmul.f32 %v140_v24, %v140_v24  ;;  %v152_v28 = vmul.f32 0.7978846, %v150_v25  ;;  %v143_v36 = vmul.f32 0.5, %v140_v24 }
  0xb5   :  { %v147_v27 = vmul.f32 %v145_v26, %v140_v24  ;;  %342 = vtanh.f32 %v152_v28 }
  0xb7   :  { %v149_v29 = vmul.f32 0.044715, %v147_v27 }
  0xb9   :  { %v151_v30 = vadd.f32 %v149_v29, %v140_v24 }
  0xbb   :  { %v153_v31 = vmul.f32 0.7978846, %v151_v30  ;;  %v343_v32 = vpop.eup %342 }
  0xbc   :  { %v156_v33 = vadd.f32 1.0, %v343_v32 }
  0xbd   :  { %344 = vtanh.f32 %v153_v31 }
  0xbe   :  { %v158_v38 = vmul.f32 %v156_v33, %v142_v35 }
  0xc3   :  { %v345_v34 = vpop.eup %344 }
  0xc4   :  { %v157_v37 = vadd.f32 1.0, %v345_v34 }
  0xc6   :  { %v159_v39 = vmul.f32 %v157_v37, %v143_v36 }
  0xc8   :  { %v160_v40 = vpack.c.bf16 %v159_v39, %v158_v38 }
  0xca   :  { %237 = vmatmul.bf16.vlgmr.msra.gmra.mxu1 %v160_v40 }
 0x147   :  { %v238_v42 = vpop.f32.mrf.mxu1 }
 0x148   :  { %v239_v43 = vadd.f32 %v341_v41, %v238_v42 }
 0x14a   :  { %243 = vst [vmem:[%s458_s5] sm:$0xff] %v239_v43 }
 0x14f   :  { %v240_v44 = vpop.f32.mrf.mxu1 }
 0x150   :  { %v241_v45 = vadd.f32 %v341_v41, %v240_v44 }
 0x152   :  { %244 = vst [vmem:[%s458_s5 + $0x8] sm:$0xff] %v241_v45 }
 0x153   :  { %249 = vsyncpa [#allocation3], 1 }
 0x154   :  { %250 = vsyncpa [#allocation5], 1 }

</bundles_post_ra>
